<compile_context>
chip_gen: v6e
topology: v6e:2x2x1
jax: 0.10.0
libtpu: 0.0.40
codegen_flags: <defaults>
</compile_context>

<pallas_src>
import jax
import jax.numpy as jnp
from jax.experimental import pallas as pl
from jax.experimental.pallas import tpu as pltpu


def _round_up(x: int, m: int) -> int:
    return (x + m - 1) // m * m


def _cost(B, K, N, itemsize):
    return pl.CostEstimate(
        flops=2 * B * K * N,
        transcendentals=0,
        bytes_accessed=(B * K + N * K + B * N) * itemsize,
    )


# ----------------------------------------------------------------------------
# Small-shape path: single invocation, whole arrays resident in VMEM.
# ----------------------------------------------------------------------------
def _linear_kernel_whole(x_ref, w_ref, o_ref):
    # x: (B, K), w: (N, K)  -> contract last axes (transposed-B matmul on MXU).
    o_ref[...] = jax.lax.dot_general(
        x_ref[...],
        w_ref[...],
        dimension_numbers=(((1,), (1,)), ((), ())),
        preferred_element_type=jnp.float32,
    ).astype(o_ref.dtype)


def _linear_single_block(x, weight):
    B, K = x.shape
    N = weight.shape[0]

    # Lane-dense output: pad N to a multiple of 128 with zero weight rows.
    N_p = _round_up(N, 128)
    # Sublane-align the batch (usually a no-op).
    B_p = _round_up(B, 8)

    x_p = x if B_p == B else jnp.pad(x, ((0, B_p - B), (0, 0)))
    w_p = weight if N_p == N else jnp.pad(weight, ((0, N_p - N), (0, 0)))

    out = pl.pallas_call(
        _linear_kernel_whole,
        out_shape=jax.ShapeDtypeStruct((B_p, N_p), x.dtype),
        in_specs=[
            pl.BlockSpec(memory_space=pltpu.MemorySpace.VMEM),
            pl.BlockSpec(memory_space=pltpu.MemorySpace.VMEM),
        ],
        out_specs=pl.BlockSpec(memory_space=pltpu.MemorySpace.VMEM),
        cost_estimate=_cost(B, K, N, x.dtype.itemsize),
    )(x_p, w_p)

    if (B_p, N_p) != (B, N):
        out = out[:B, :N]
    return out


# ----------------------------------------------------------------------------
# Large-shape path: tiled matmul with f32 accumulator scratch.
# ----------------------------------------------------------------------------
def _linear_kernel_tiled(x_ref, w_ref, o_ref, acc_ref):
    @pl.when(pl.program_id(2) == 0)
    def _init():
        acc_ref[...] = jnp.zeros_like(acc_ref)

    acc_ref[...] += jax.lax.dot_general(
        x_ref[...],
        w_ref[...],
        dimension_numbers=(((1,), (1,)), ((), ())),
        preferred_element_type=jnp.float32,
    )

    @pl.when(pl.program_id(2) == pl.num_programs(2) - 1)
    def _store():
        o_ref[...] = acc_ref[...].astype(o_ref.dtype)


def _linear_tiled(x, weight, *, tm=128, tn=128, tk=512):
    B, K = x.shape
    N = weight.shape[0]

    # Clamp tiles to (padded) problem size; keep them (sublane, lane) legal.
    tm = min(tm, _round_up(B, 16))
    tn = min(tn, _round_up(N, 128))
    tk = min(tk, _round_up(K, 128))

    M_p, N_p, K_p = _round_up(B, tm), _round_up(N, tn), _round_up(K, tk)
    x_p = x if (M_p, K_p) == (B, K) else jnp.pad(x, ((0, M_p - B), (0, K_p - K)))
    w_p = (
        weight
        if (N_p, K_p) == (N, K)
        else jnp.pad(weight, ((0, N_p - N), (0, K_p - K)))
    )

    grid = (M_p // tm, N_p // tn, K_p // tk)  # K (reduction) innermost.

    out = pl.pallas_call(
        _linear_kernel_tiled,
        out_shape=jax.ShapeDtypeStruct((M_p, N_p), x.dtype),
        grid_spec=pltpu.PrefetchScalarGridSpec(
            num_scalar_prefetch=0,
            grid=grid,
            in_specs=[
                pl.BlockSpec((tm, tk), lambda i, j, k: (i, k)),  # x tile
                pl.BlockSpec((tn, tk), lambda i, j, k: (j, k)),  # W tile (N,K)
            ],
            out_specs=pl.BlockSpec((tm, tn), lambda i, j, k: (i, j)),
            scratch_shapes=[pltpu.VMEM((tm, tn), jnp.float32)],
        ),
        compiler_params=pltpu.CompilerParams(
            dimension_semantics=("parallel", "parallel", "arbitrary"),
        ),
        cost_estimate=_cost(B, K, N, x.dtype.itemsize),
    )(x_p, w_p)

    if (M_p, N_p) != (B, N):
        out = out[:B, :N]
    return out


# ----------------------------------------------------------------------------
# Public wrapper (forward pass of SingleLayerPerceptron).
# ----------------------------------------------------------------------------
def single_layer_perceptron(x, weight, *, force_tiled=False):
    """x: (B, input_size), weight: (output_size, input_size) -> (B, output_size)."""
    B, K = x.shape
    N, K_w = weight.shape
    assert K == K_w, "weight/input size mismatch"

    total_bytes = (B * K + N * K + B * N) * x.dtype.itemsize
    if force_tiled or total_bytes > 4 * 1024 * 1024:
        return _linear_tiled(x, weight)
    return _linear_single_block(x, weight)


if __name__ == "__main__":
    # Small shapes consistent with the module: a plain dense layer.
    batch, input_size, output_size = 8, 32, 16

    key = jax.random.PRNGKey(0)
    kx, kw = jax.random.split(key)

    # Deterministic synthetic init mirroring torch.nn.init.normal_(W, 0, 1).
    weight = jax.random.normal(kw, (output_size, input_size), dtype=jnp.float32)
    x = jax.random.normal(kx, (batch, input_size), dtype=jnp.float32)

    y = jax.block_until_ready(single_layer_perceptron(x, weight))
    y_ref = x @ weight.T
    assert y.shape == (batch, output_size)
    assert jnp.allclose(y, y_ref, atol=1e-5, rtol=1e-5)

    # Exercise the tiled (production-size) path once, with bf16 operands and
    # f32 accumulation (loose tolerance: bf16 output rounding / accum order).
    kx2, kw2 = jax.random.split(jax.random.PRNGKey(1))
    x2 = jax.random.normal(kx2, (256, 384), dtype=jnp.bfloat16)
    w2 = jax.random.normal(kw2, (192, 384), dtype=jnp.bfloat16)
    y2 = jax.block_until_ready(single_layer_perceptron(x2, w2, force_tiled=True))
    y2_ref = x2 @ w2.T
    assert y2.shape == (256, 192)
    assert jnp.allclose(
        y2.astype(jnp.float32), y2_ref.astype(jnp.float32), rtol=2e-2, atol=1e-1
    )

    print("KERNEL_OK")
</pallas_src>

<mosaic_0001>
module attributes {stable_mosaic.version = 11 : i64} {
  func.func @_linear_kernel_whole(%arg0: memref<8x32xf32, #tpu.memory_space<vmem>>, %arg1: memref<128x32xf32, #tpu.memory_space<vmem>>, %arg2: memref<8x128xf32, #tpu.memory_space<vmem>>) attributes {dimension_semantics = [], scalar_prefetch = 0 : i64, scratch_operands = 0 : i64, tpu.core_type = #tpu.core_type<tc>} {
    %c0 = arith.constant 0 : index
    %c0_0 = arith.constant 0 : index
    %0 = vector.load %arg0[%c0, %c0_0] : memref<8x32xf32, #tpu.memory_space<vmem>>, vector<8x32xf32>
    %c0_1 = arith.constant 0 : index
    %c0_2 = arith.constant 0 : index
    %1 = vector.load %arg1[%c0_1, %c0_2] : memref<128x32xf32, #tpu.memory_space<vmem>>, vector<128x32xf32>
    %cst = arith.constant dense<0.000000e+00> : vector<8x128xf32>
    %2 = tpu.matmul %0, %1, %cst {dimension_numbers = #tpu.dot_dimension_numbers<[1], [1], [0], [0], [0, 0, 1, 0], [], []>} : vector<8x32xf32>, vector<128x32xf32>, vector<8x128xf32> -> vector<8x128xf32>
    %c0_3 = arith.constant 0 : index
    %c0_4 = arith.constant 0 : index
    %3 = vector.load %arg2[%c0_3, %c0_4] : memref<8x128xf32, #tpu.memory_space<vmem>>, vector<8x128xf32>
    tpu.vector_store %arg2[%c0_3, %c0_4], %2 {strides = array<i32>} : memref<8x128xf32, #tpu.memory_space<vmem>>, vector<8x128xf32>,
    return
  }
}

</mosaic_0001>

<bundles_post_ra>
// kernel: tpu_custom_call.1
= control target key start
LH: loop header
LB: loop body
LE: loop exit
PB: predicated region body
PF: predicated region fallthrough
CT: control target
= control target key end

     0   :  { %vm29_vm0 = vcmask 261120   ;;  %v260_v1 = vmov 0.0   ;;  %vm261_vm1 = vmmov 0   ;;  %s349_s0 = inlined_call_operand.vmem [shape: f32[8,32], index: 0, kind: input, shape index: {}]   ;;  %s350_s1 = inlined_call_operand.vmem [shape: f32[128,32], index: 1, kind: input, shape index: {}]   ;;  %s351_s2 = inlined_call_operand.hbm [shape: f32[8,128], index: 2, kind: output, shape index: {}]  }
   0x1   :  { %v28_v0 = vld [vmem:[%s350_s1 + $0x78] sm:$0xff]  ;;  %200 = vmatprep.subr.mxu0 %v260_v1  ;;  %232 = vmatprep.mubr.msk.f32.mxu0 %vm261_vm1, %v260_v1  ;;  %v27_v2 = vld [vmem:[%s350_s1 + $0x70] sm:$0xff] }
   0x2   :  { %201 = vmatpush3.xpose.msk.msra.mxu0 %vm29_vm0, %v28_v0 }
   0x3   :  { %202 = vmatprep.subr.mxu0 %v260_v1 }
   0x4   :  { %7 = vsyncpa [#allocation3], 0  ;;  %v26_v3 = vld [vmem:[%s350_s1 + $0x68] sm:$0xff]  ;;  %v25_v4 = vld [vmem:[%s350_s1 + $0x60] sm:$0xff]  ;;  %s262_s15 = smov [#allocation2]  }
   0x5   :  { %v24_v5 = vld [vmem:[%s350_s1 + $0x58] sm:$0xff]  ;;  %v23_v6 = vld [vmem:[%s350_s1 + $0x50] sm:$0xff]  ;;  %v22_v7 = vld [vmem:[%s350_s1 + $0x48] sm:$0xff]  ;;  %s158_s16 = sshll.u32 %s262_s15, 4  ;;  %s159_s16 = int_to_ptr.vmem [resolvable:$true] %s158_s16 }
   0x6   :  { %203 = vmatpush3.xpose.msk.msra.mxu0 %vm29_vm0, %v27_v2  ;;  %v21_v8 = vld [vmem:[%s350_s1 + $0x40] sm:$0xff]  ;;  %v20_v9 = vld [vmem:[%s350_s1 + $0x38] sm:$0xff]  ;;  %v19_v10 = vld [vmem:[%s350_s1 + $0x30] sm:$0xff]  ;;  %s238_s17 = scalar_lea.vmem %s159_s16, 128  ;;  %p243_p1 = scmp.lt.s32.totalorder %s159_s16, %s159_s16 }
   0x7   :  { %204 = vmatprep.subr.mxu0 %v260_v1  ;;  %v18_v11 = vld [vmem:[%s350_s1 + $0x28] sm:$0xff]  ;;  %v17_v12 = vld [vmem:[%s350_s1 + $0x20] sm:$0xff]  ;;  %v16_v13 = vld [vmem:[%s350_s1 + $0x18] sm:$0xff]  ;;  %p239_p0 = scmp.ne.s32.totalorder %s159_s16, %s238_s17  ;;  %p244_p2 = scmp.lt.s32.totalorder %s238_s17, %s238_s17 }
   0x8   :  { %v15_v14 = vld [vmem:[%s350_s1 + $0x10] sm:$0xff]  ;;  %v14_v15 = vld [vmem:[%s350_s1 + $0x8] sm:$0xff]  ;;  %v13_v16 = vld [vmem:[%s350_s1] sm:$0xff] }
   0x9   :  { %v12_v17 = vld [vmem:[%s349_s0] sm:$0xff]  ;;  %p245_p3 = por %p244_p2, %p243_p1 }
   0xa   :  { %205 = vmatpush3.xpose.msk.msra.mxu0 %vm29_vm0, %v26_v3 }
   0xb   :  { %206 = vmatprep.subr.mxu0 %v260_v1  ;;  %p246_p4 = pnand %p245_p3, %p239_p0 }
   0xe   :  { %207 = vmatpush3.xpose.msk.msra.mxu0 %vm29_vm0, %v25_v4 }
   0xf   :  { %208 = vmatprep.subr.mxu0 %v260_v1 }
  0x12   :  { %209 = vmatpush3.xpose.msk.msra.mxu0 %vm29_vm0, %v24_v5 }
  0x13   :  { %210 = vmatprep.subr.mxu0 %v260_v1 }
  0x16   :  { %211 = vmatpush3.xpose.msk.msra.mxu0 %vm29_vm0, %v23_v6 }
  0x17   :  { %212 = vmatprep.subr.mxu0 %v260_v1 }
  0x1a   :  { %213 = vmatpush3.xpose.msk.msra.mxu0 %vm29_vm0, %v22_v7 }
  0x1b   :  { %214 = vmatprep.subr.mxu0 %v260_v1 }
  0x1e   :  { %215 = vmatpush3.xpose.msk.msra.mxu0 %vm29_vm0, %v21_v8 }
  0x1f   :  { %216 = vmatprep.subr.mxu0 %v260_v1 }
  0x22   :  { %217 = vmatpush3.xpose.msk.msra.mxu0 %vm29_vm0, %v20_v9 }
  0x23   :  { %218 = vmatprep.subr.mxu0 %v260_v1 }
  0x26   :  { %219 = vmatpush3.xpose.msk.msra.mxu0 %vm29_vm0, %v19_v10 }
  0x27   :  { %220 = vmatprep.subr.mxu0 %v260_v1 }
  0x2a   :  { %221 = vmatpush3.xpose.msk.msra.mxu0 %vm29_vm0, %v18_v11 }
  0x2b   :  { %222 = vmatprep.subr.mxu0 %v260_v1 }
  0x2e   :  { %223 = vmatpush3.xpose.msk.msra.mxu0 %vm29_vm0, %v17_v12 }
  0x2f   :  { %224 = vmatprep.subr.mxu0 %v260_v1 }
  0x32   :  { %225 = vmatpush3.xpose.msk.msra.mxu0 %vm29_vm0, %v16_v13 }
  0x33   :  { %226 = vmatprep.subr.mxu0 %v260_v1 }
  0x36   :  { %227 = vmatpush3.xpose.msk.msra.mxu0 %vm29_vm0, %v15_v14 }
  0x37   :  { %228 = vmatprep.subr.mxu0 %v260_v1 }
  0x3a   :  { %229 = vmatpush3.xpose.msk.msra.mxu0 %vm29_vm0, %v14_v15 }
  0x3b   :  { %230 = vmatprep.subr.mxu0 %v260_v1 }
  0x3e   :  { %231 = vmatpush3.xpose.msk.msra.mxu0 %vm29_vm0, %v13_v16 }
  0x41   :  { %233 = vmatmul.mubr.msk.f32.vlgmr.msra.gmra.mxu0 %vm29_vm0, %v12_v17 }
 0x101   :  { %v147_v18 = vpop.f32.mrf.mxu0 }
 0x102   :  { %151 = vst [vmem:[#allocation2] sm:$0xff] %v147_v18 }
 0x103   :  { %v234_v19 = vpop.f32.mrf.mxu0 }
 0x104   :  { %249 = shalt.err (!%p246_p4)
}
 0x105   :  { %161 = dma.vmem_to_hbm [thread:$0]  %s159_s16, 128, %s351_s2, [#allocation3]  }
 0x106   :  { %258 = dma.done.wait [#allocation3], 128  }
 0x107   :  { %259 = vsyncadd [#allocation3], 4294967168 }
 0x108   :  { %165 = vsyncpa [#allocation3], 1 }

</bundles_post_ra>
